<compile_context>
chip_gen: v6e
topology: v6e:2x2x1
jax: 0.10.0
libtpu: 0.0.40
codegen_flags: <defaults>
</compile_context>

<pallas_src>
import math

import jax
import jax.numpy as jnp
from jax import lax
from jax.experimental import pallas as pl
from jax.experimental.pallas import tpu as pltpu

K = 32 * 32 * 3   # 3072, hard-coded by the module's flatten
N = 10
MAX_TB = 256      # activation tile rows: 3 MiB/buffer f32, safe on all gens


def _round_up(x, m):
    return ((x + m - 1) // m) * m


def _lazynet_kernel(x_ref, w_ref, b_ref, o_ref):
    """o = x @ W^T + b for one batch tile; weight kept in native (N, K) layout."""
    o_ref[...] = (
        lax.dot_general(
            x_ref[...],                       # (TB, K)
            w_ref[...],                       # (N, K)
            dimension_numbers=(((1,), (1,)), ((), ())),
            preferred_element_type=jnp.float32,
        )
        + b_ref[...]                          # (1, N) broadcast add
    ).astype(o_ref.dtype)


def lazynet_forward(x_nchw, weight, bias):
    """x_nchw: (B, 3, 32, 32) f32; weight: (10, 3072); bias: (10,) -> (B, 10)."""
    B = x_nchw.shape[0]
    assert weight.shape == (N, K)
    assert bias.shape == (N,)

    # Flatten exactly like torch's x.view(-1, 3072) (C, H, W fastest-varying last).
    x2d = x_nchw.reshape(B, K)

    # Batch tile: small batches stay a single step (padded to 8 sublanes);
    # large batches tile at MAX_TB rows so the activation DMA pipelines and
    # VMEM stays bounded on every generation.
    TB = min(MAX_TB, max(8, _round_up(B, 8)))
    Bp = _round_up(B, TB)
    if Bp != B:
        x2d = jnp.pad(x2d, ((0, Bp - B), (0, 0)))   # zero rows, sliced off below

    b2d = bias.reshape(1, N)   # 2D bias for in-kernel broadcast add
    grid = (Bp // TB,)

    out = pl.pallas_call(
        _lazynet_kernel,
        out_shape=jax.ShapeDtypeStruct((Bp, N), x2d.dtype),
        grid=grid,
        in_specs=[
            pl.BlockSpec((TB, K), lambda i: (i, 0)),   # activations: tiled over batch
            pl.BlockSpec((N, K), lambda i: (0, 0)),    # weight: native layout, resident
            pl.BlockSpec((1, N), lambda i: (0, 0)),    # bias: resident
        ],
        out_specs=pl.BlockSpec((TB, N), lambda i: (i, 0)),
        compiler_params=pltpu.CompilerParams(
            dimension_semantics=("parallel",),         # shards tiles across TCs on v7x
        ),
    )(x2d, weight, b2d)

    return out[:B]


def init_params(key):
    """Deterministic init mimicking nn.Linear(3072, 10) default (U[-1/sqrt(K), 1/sqrt(K)])."""
    kw, kb = jax.random.split(key)
    bound = 1.0 / math.sqrt(K)
    weight = jax.random.uniform(kw, (N, K), jnp.float32, -bound, bound)
    bias = jax.random.uniform(kb, (N,), jnp.float32, -bound, bound)
    return weight, bias


if __name__ == "__main__":
    key = jax.random.PRNGKey(0)
    k_x, k_p = jax.random.split(key)

    # CIFAR-like input: batch=2, NCHW (2, 3, 32, 32) — spatial size is fixed by
    # the module's hard-coded 32*32*3 flatten.
    x = jax.random.normal(k_x, (2, 3, 32, 32), jnp.float32)
    weight, bias = init_params(k_p)

    out = lazynet_forward(x, weight, bias)
    out = jax.block_until_ready(out)

    # Sanity check against plain-JAX reference.
    ref = x.reshape(2, -1) @ weight.T + bias
    assert out.shape == (2, 10)
    assert jnp.allclose(out, ref, atol=1e-4, rtol=1e-4)

    # Also exercise a multi-tile batch to validate the grid path.
    xb = jax.random.normal(k_x, (2 * MAX_TB + 37, 3, 32, 32), jnp.float32)
    outb = jax.block_until_ready(lazynet_forward(xb, weight, bias))
    refb = xb.reshape(xb.shape[0], -1) @ weight.T + bias
    assert outb.shape == (xb.shape[0], N)
    assert jnp.allclose(outb, refb, atol=1e-4, rtol=1e-4)

    print("KERNEL_OK")
</pallas_src>

<mosaic_0001>
module attributes {stable_mosaic.version = 11 : i64} {
  func.func @_lazynet_kernel(%arg0: i32, %arg1: memref<8x3072xf32, #tpu.memory_space<vmem>>, %arg2: memref<10x3072xf32, #tpu.memory_space<vmem>>, %arg3: memref<1x10xf32, #tpu.memory_space<vmem>>, %arg4: memref<8x10xf32, #tpu.memory_space<vmem>>) attributes {dimension_semantics = [#tpu.dimension_semantics<parallel>], iteration_bounds = array<i64: 1>, scalar_prefetch = 0 : i64, scratch_operands = 0 : i64, tpu.core_type = #tpu.core_type<tc>, window_params = [{transform_indices = @transform_0, window_bounds = array<i64: 8, 3072>}, {pipeline_mode = #tpu.pipeline_mode<synchronous>, transform_indices = @transform_1, window_bounds = array<i64: 10, 3072>}, {pipeline_mode = #tpu.pipeline_mode<synchronous>, transform_indices = @transform_2, window_bounds = array<i64: 1, 10>}, {transform_indices = @transform_3, window_bounds = array<i64: 8, 10>}]} {
    %c0 = arith.constant 0 : index
    %c0_0 = arith.constant 0 : index
    %0 = vector.load %arg1[%c0, %c0_0] : memref<8x3072xf32, #tpu.memory_space<vmem>>, vector<8x3072xf32>
    %c0_1 = arith.constant 0 : index
    %c0_2 = arith.constant 0 : index
    %1 = vector.load %arg2[%c0_1, %c0_2] : memref<10x3072xf32, #tpu.memory_space<vmem>>, vector<10x3072xf32>
    %cst = arith.constant dense<0.000000e+00> : vector<8x10xf32>
    %2 = tpu.matmul %0, %1, %cst {dimension_numbers = #tpu.dot_dimension_numbers<[1], [1], [0], [0], [0, 0, 1, 0], [], []>} : vector<8x3072xf32>, vector<10x3072xf32>, vector<8x10xf32> -> vector<8x10xf32>
    %c0_3 = arith.constant 0 : index
    %c0_4 = arith.constant 0 : index
    %3 = vector.load %arg3[%c0_3, %c0_4] : memref<1x10xf32, #tpu.memory_space<vmem>>, vector<1x10xf32>
    %4 = vector.broadcast %3 : vector<1x10xf32> to vector<8x10xf32>
    %5 = arith.addf %2, %4 : vector<8x10xf32>
    %c0_5 = arith.constant 0 : index
    %c0_6 = arith.constant 0 : index
    %6 = vector.load %arg4[%c0_5, %c0_6] : memref<8x10xf32, #tpu.memory_space<vmem>>, vector<8x10xf32>
    tpu.vector_store %arg4[%c0_5, %c0_6], %5 {strides = array<i32>} : memref<8x10xf32, #tpu.memory_space<vmem>>, vector<8x10xf32>,
    return
  }
  func.func @transform_0(%arg0: i32) -> (i32, i32) {
    %c0_i32 = arith.constant 0 : i32
    %c0_i32_0 = arith.constant 0 : i32
    return %arg0, %c0_i32 : i32, i32
  }
  func.func @transform_1(%arg0: i32) -> (i32, i32) {
    %c0_i32 = arith.constant 0 : i32
    %c0_i32_0 = arith.constant 0 : i32
    %c0_i32_1 = arith.constant 0 : i32
    return %c0_i32, %c0_i32_0 : i32, i32
  }
  func.func @transform_2(%arg0: i32) -> (i32, i32) {
    %c0_i32 = arith.constant 0 : i32
    %c0_i32_0 = arith.constant 0 : i32
    %c0_i32_1 = arith.constant 0 : i32
    return %c0_i32, %c0_i32_0 : i32, i32
  }
  func.func @transform_3(%arg0: i32) -> (i32, i32) {
    %c0_i32 = arith.constant 0 : i32
    %c0_i32_0 = arith.constant 0 : i32
    return %arg0, %c0_i32 : i32, i32
  }
}

</mosaic_0001>

<bundles_post_ra>
// kernel: tpu_custom_call.1
= control target key start
LH: loop header
LB: loop body
LE: loop exit
PB: predicated region body
PF: predicated region fallthrough
CT: control target
= control target key end

     0   :  { %8 = vsyncpa [#allocation3], 0  ;;  %s1087_s0 = inlined_call_operand.hbm [shape: f32[8,3072], index: 0, kind: input, shape index: {}]   ;;  %s1088_s1 = inlined_call_operand.hbm [shape: f32[10,3072], index: 1, kind: input, shape index: {}]   ;;  %s1089_s2 = inlined_call_operand.vmem [shape: f32[1,10], index: 2, kind: input, shape index: {}]   ;;  %s1090_s3 = inlined_call_operand.hbm [shape: f32[8,10], index: 3, kind: output, shape index: {}]  }
   0x1   :  { %9 = vsyncpa [#allocation6], 0 }
   0x2   :  { %10 = vsyncpa [#allocation4], 0  ;;  %s1050_s12 = smov [#allocation2]   ;;  %s1051_s14 = smov [#allocation5]  }
   0x3   :  { %s17_s13 = sshll.u32 %s1050_s12, 4  ;;  %s26_s15 = sshll.u32 %s1051_s14, 4  ;;  %s18_s13 = int_to_ptr.vmem [resolvable:$true] %s17_s13  ;;  %s27_s15 = int_to_ptr.vmem [resolvable:$true] %s26_s15 }
   0x4   :  { %s992_s16 = scalar_lea.vmem %s18_s13, 3072  ;;  %p997_p1 = scmp.lt.s32.totalorder %s18_s13, %s18_s13 }
   0x5   :  { %p993_p0 = scmp.ne.s32.totalorder %s18_s13, %s992_s16  ;;  %p998_p2 = scmp.lt.s32.totalorder %s992_s16, %s992_s16 }
   0x7   :  { %p999_p3 = por %p998_p2, %p997_p1 }
   0x9   :  { %p1000_p4 = pnand %p999_p3, %p993_p0 }
   0xb   :  { %1003 = shalt.err (!%p1000_p4)
}
   0xc   :  { %20 = dma.hbm_to_vmem [thread:$0]  %s1087_s0, 3072, %s18_s13, [#allocation3]  }
   0xd   :  { %s1012_s19 = scalar_lea.vmem %s27_s15, 6144  ;;  %p1017_p6 = scmp.lt.s32.totalorder %s27_s15, %s27_s15 }
   0xe   :  { %p1013_p5 = scmp.ne.s32.totalorder %s27_s15, %s1012_s19  ;;  %p1018_p7 = scmp.lt.s32.totalorder %s1012_s19, %s1012_s19 }
  0x10   :  { %p1019_p8 = por %p1018_p7, %p1017_p6 }
  0x12   :  { %p1020_p9 = pnand %p1019_p8, %p1013_p5 }
  0x14   :  { %1023 = shalt.err (!%p1020_p9)
}
  0x15   :  { %s1052_s20 = smov 3072   ;;  %s1053_s21 = smov 192  }
  0x16   :  { %32 = dma.hbm_to_vmem [thread:$0]  %s1088_s1, 6144, %s27_s15, [#allocation6], %s1052_s20, %s1052_s20, %s1053_s21  }
  0x17   :  { %1044 = dma.done.wait [#allocation3], 3072  }
  0x18   :  { %1045 = vsyncadd [#allocation3], 4294964224 }
  0x19   :  { %1046 = dma.done.wait [#allocation6], 6144  }
  0x1a   :  { %1047 = vsyncadd [#allocation6], 4294961152  ;;  %v90_v0 = vld [vmem:[#allocation5 + $0xc8] sm:$0x3]  ;;  %v92_v1 = vld [vmem:[#allocation5 + $0xd8] sm:$0x3] }
  0x1b   :  { %v89_v2 = vld [vmem:[#allocation5 + $0xc0] sm:$0x3]  ;;  %148 = vmatprep.subr.mxu0 %v90_v0  ;;  %218 = vmatprep.subr.mxu1 %v92_v1  ;;  %v91_v3 = vld [vmem:[#allocation5 + $0xd0] sm:$0x3]  ;;  %v66_v4 = vld [vmem:[#allocation5 + $0x8] sm:$0xff]  ;;  %vm960_vm0 = vcmask 80896  }
  0x1c   :  { %v68_v5 = vld [vmem:[#allocation5 + $0x18] sm:$0xff]  ;;  %149 = vmatpush1.xpose.msra.mxu0 %v89_v2  ;;  %219 = vmatpush1.xpose.msra.mxu1 %v91_v3  ;;  %v42_v6 = vld [vmem:[#allocation2 + $0x8] sm:$0xff]  ;;  %v65_v7 = vld [vmem:[#allocation5] sm:$0xff] }
  0x1d   :  { %150 = vmatprep.subr.mxu0 %v66_v4  ;;  %220 = vmatprep.subr.mxu1 %v68_v5  ;;  %v67_v8 = vld [vmem:[#allocation5 + $0x10] sm:$0xff]  ;;  %v44_v9 = vld [vmem:[#allocation2 + $0x18] sm:$0xff]  ;;  %v94_v10 = vld [vmem:[#allocation5 + $0xe8] sm:$0x3] }
  0x1e   :  { %184 = vmatprep.mubr.f32.mxu0 %v42_v6  ;;  %254 = vmatprep.mubr.f32.mxu1 %v44_v9  ;;  %v96_v11 = vld [vmem:[#allocation5 + $0xf8] sm:$0x3]  ;;  %v41_v12 = vld [vmem:[#allocation2] sm:$0xff]  ;;  %v43_v13 = vld [vmem:[#allocation2 + $0x10] sm:$0xff] }
  0x1f   :  { %v93_v14 = vld [vmem:[#allocation5 + $0xe0] sm:$0x3]  ;;  %v95_v15 = vld [vmem:[#allocation5 + $0xf0] sm:$0x3]  ;;  %v70_v16 = vld [vmem:[#allocation5 + $0x28] sm:$0xff] }
  0x20   :  { %151 = vmatpush1.xpose.msra.mxu0 %v65_v7  ;;  %221 = vmatpush1.xpose.msra.mxu1 %v67_v8  ;;  %v72_v17 = vld [vmem:[#allocation5 + $0x38] sm:$0xff]  ;;  %v46_v18 = vld [vmem:[#allocation2 + $0x28] sm:$0xff]  ;;  %v69_v20 = vld [vmem:[#allocation5 + $0x20] sm:$0xff] }
  0x21   :  { %288 = vmatprep.subr.mxu0 %v94_v10  ;;  %358 = vmatprep.subr.mxu1 %v96_v11  ;;  %v48_v19 = vld [vmem:[#allocation2 + $0x38] sm:$0xff]  ;;  %v71_v21 = vld [vmem:[#allocation5 + $0x30] sm:$0xff]  ;;  %v98_v22 = vld [vmem:[#allocation5 + $0x108] sm:$0x3] }
  0x22   :  { %v100_v23 = vld [vmem:[#allocation5 + $0x118] sm:$0x3]  ;;  %v45_v24 = vld [vmem:[#allocation2 + $0x20] sm:$0xff]  ;;  %v47_v25 = vld [vmem:[#allocation2 + $0x30] sm:$0xff] }
  0x23   :  { %185 = vmatmul.mubr.f32.vlgmr.msra.gmra.mxu0 %v41_v12  ;;  %255 = vmatmul.mubr.f32.vlgmr.msra.gmra.mxu1 %v43_v13  ;;  %v97_v26 = vld [vmem:[#allocation5 + $0x100] sm:$0x3]  ;;  %v99_v27 = vld [vmem:[#allocation5 + $0x110] sm:$0x3]  ;;  %v74_v28 = vld [vmem:[#allocation5 + $0x48] sm:$0xff] }
  0x24   :  { %289 = vmatpush1.xpose.msra.mxu0 %v93_v14  ;;  %359 = vmatpush1.xpose.msra.mxu1 %v95_v15  ;;  %v76_v29 = vld [vmem:[#allocation5 + $0x58] sm:$0xff]  ;;  %v50_v30 = vld [vmem:[#allocation2 + $0x48] sm:$0xff]  ;;  %v73_v32 = vld [vmem:[#allocation5 + $0x40] sm:$0xff] }
  0x25   :  { %290 = vmatprep.subr.mxu0 %v70_v16  ;;  %360 = vmatprep.subr.mxu1 %v72_v17  ;;  %v52_v31 = vld [vmem:[#allocation2 + $0x58] sm:$0xff]  ;;  %v75_v33 = vld [vmem:[#allocation5 + $0x50] sm:$0xff]  ;;  %v102_v34 = vld [vmem:[#allocation5 + $0x128] sm:$0x3] }
  0x26   :  { %324 = vmatprep.mubr.f32.mxu0 %v46_v18  ;;  %394 = vmatprep.mubr.f32.mxu1 %v48_v19  ;;  %v104_v35 = vld [vmem:[#allocation5 + $0x138] sm:$0x3]  ;;  %v49_v36 = vld [vmem:[#allocation2 + $0x40] sm:$0xff]  ;;  %v51_v37 = vld [vmem:[#allocation2 + $0x50] sm:$0xff] }
  0x27   :  { %v101_v38 = vld [vmem:[#allocation5 + $0x120] sm:$0x3]  ;;  %v103_v39 = vld [vmem:[#allocation5 + $0x130] sm:$0x3]  ;;  %v78_v40 = vld [vmem:[#allocation5 + $0x68] sm:$0xff] }
  0x28   :  { %291 = vmatpush1.xpose.msra.mxu0 %v69_v20  ;;  %361 = vmatpush1.xpose.msra.mxu1 %v71_v21  ;;  %v80_v41 = vld [vmem:[#allocation5 + $0x78] sm:$0xff]  ;;  %v54_v42 = vld [vmem:[#allocation2 + $0x68] sm:$0xff]  ;;  %v77_v44 = vld [vmem:[#allocation5 + $0x60] sm:$0xff] }
  0x29   :  { %428 = vmatprep.subr.mxu0 %v98_v22  ;;  %498 = vmatprep.subr.mxu1 %v100_v23  ;;  %v56_v43 = vld [vmem:[#allocation2 + $0x78] sm:$0xff]  ;;  %v79_v45 = vld [vmem:[#allocation5 + $0x70] sm:$0xff]  ;;  %v106_v46 = vld [vmem:[#allocation5 + $0x148] sm:$0x3] }
  0x2a   :  { %v108_v47 = vld [vmem:[#allocation5 + $0x158] sm:$0x3]  ;;  %v53_v48 = vld [vmem:[#allocation2 + $0x60] sm:$0xff]  ;;  %v55_v49 = vld [vmem:[#allocation2 + $0x70] sm:$0xff] }
  0x2b   :  { %325 = vmatmul.mubr.f32.vlgmr.msra.gmra.mxu0 %v45_v24  ;;  %395 = vmatmul.mubr.f32.vlgmr.msra.gmra.mxu1 %v47_v25  ;;  %v105_v50 = vld [vmem:[#allocation5 + $0x140] sm:$0x3]  ;;  %v107_v51 = vld [vmem:[#allocation5 + $0x150] sm:$0x3]  ;;  %v82_v52 = vld [vmem:[#allocation5 + $0x88] sm:$0xff] }
  0x2c   :  { %429 = vmatpush1.xpose.msra.mxu0 %v97_v26  ;;  %499 = vmatpush1.xpose.msra.mxu1 %v99_v27  ;;  %v84_v53 = vld [vmem:[#allocation5 + $0x98] sm:$0xff]  ;;  %v58_v54 = vld [vmem:[#allocation2 + $0x88] sm:$0xff]  ;;  %v81_v56 = vld [vmem:[#allocation5 + $0x80] sm:$0xff] }
  0x2d   :  { %430 = vmatprep.subr.mxu0 %v74_v28  ;;  %500 = vmatprep.subr.mxu1 %v76_v29  ;;  %v60_v55 = vld [vmem:[#allocation2 + $0x98] sm:$0xff]  ;;  %v83_v57 = vld [vmem:[#allocation5 + $0x90] sm:$0xff]  ;;  %v110_v58 = vld [vmem:[#allocation5 + $0x168] sm:$0x3] }
  0x2e   :  { %464 = vmatprep.mubr.f32.mxu0 %v50_v30  ;;  %534 = vmatprep.mubr.f32.mxu1 %v52_v31  ;;  %v112_v59 = vld [vmem:[#allocation5 + $0x178] sm:$0x3]  ;;  %v57_v60 = vld [vmem:[#allocation2 + $0x80] sm:$0xff]  ;;  %v59_v61 = vld [vmem:[#allocation2 + $0x90] sm:$0xff] }
  0x2f   :  { %v109_v62 = vld [vmem:[#allocation5 + $0x160] sm:$0x3]  ;;  %v111_v63 = vld [vmem:[#allocation5 + $0x170] sm:$0x3]  ;;  %v86_v0 = vld [vmem:[#allocation5 + $0xa8] sm:$0xff] }
  0x30   :  { %431 = vmatpush1.xpose.msra.mxu0 %v73_v32  ;;  %501 = vmatpush1.xpose.msra.mxu1 %v75_v33  ;;  %v88_v1 = vld [vmem:[#allocation5 + $0xb8] sm:$0xff]  ;;  %v62_v2 = vld [vmem:[#allocation2 + $0xa8] sm:$0xff]  ;;  %v85_v4 = vld [vmem:[#allocation5 + $0xa0] sm:$0xff] }
  0x31   :  { %568 = vmatprep.subr.mxu0 %v102_v34  ;;  %638 = vmatprep.subr.mxu1 %v104_v35  ;;  %v64_v3 = vld [vmem:[#allocation2 + $0xb8] sm:$0xff]  ;;  %v87_v5 = vld [vmem:[#allocation5 + $0xb0] sm:$0xff]  ;;  %v61_v6 = vld [vmem:[#allocation2 + $0xa0] sm:$0xff] }
  0x32   :  { %v63_v7 = vld [vmem:[#allocation2 + $0xb0] sm:$0xff]  ;;  %v978_v12 = vld [vmem:[%s1089_s2] ss:$0 sm:$0xff]  ;;  %s1054_s2 = smov [#allocation7]  }
  0x33   :  { %465 = vmatmul.mubr.f32.vlgmr.msra.gmra.mxu0 %v49_v36  ;;  %535 = vmatmul.mubr.f32.vlgmr.msra.gmra.mxu1 %v51_v37  ;;  %s968_s24 = sshll.u32 %s1054_s2, 4  ;;  %s969_s24 = int_to_ptr.vmem [resolvable:$true] %s968_s24 }
  0x34   :  { %569 = vmatpush1.xpose.msra.mxu0 %v101_v38  ;;  %639 = vmatpush1.xpose.msra.mxu1 %v103_v39  ;;  %s1024_s25 = scalar_lea.vmem %s969_s24, 128  ;;  %p1029_p11 = scmp.lt.s32.totalorder %s969_s24, %s969_s24 }
  0x35   :  { %570 = vmatprep.subr.mxu0 %v78_v40  ;;  %640 = vmatprep.subr.mxu1 %v80_v41  ;;  %p1025_p10 = scmp.ne.s32.totalorder %s969_s24, %s1024_s25  ;;  %p1030_p12 = scmp.lt.s32.totalorder %s1024_s25, %s1024_s25 }
  0x36   :  { %604 = vmatprep.mubr.f32.mxu0 %v54_v42  ;;  %674 = vmatprep.mubr.f32.mxu1 %v56_v43 }
  0x37   :  { %p1031_p13 = por %p1030_p12, %p1029_p11 }
  0x38   :  { %571 = vmatpush1.xpose.msra.mxu0 %v77_v44  ;;  %641 = vmatpush1.xpose.msra.mxu1 %v79_v45 }
  0x39   :  { %708 = vmatprep.subr.mxu0 %v106_v46  ;;  %778 = vmatprep.subr.mxu1 %v108_v47  ;;  %p1032_p0 = pnand %p1031_p13, %p1025_p10 }
  0x3b   :  { %605 = vmatmul.mubr.f32.vlgmr.msra.gmra.mxu0 %v53_v48  ;;  %675 = vmatmul.mubr.f32.vlgmr.msra.gmra.mxu1 %v55_v49 }
  0x3c   :  { %709 = vmatpush1.xpose.msra.mxu0 %v105_v50  ;;  %779 = vmatpush1.xpose.msra.mxu1 %v107_v51 }
  0x3d   :  { %710 = vmatprep.subr.mxu0 %v82_v52  ;;  %780 = vmatprep.subr.mxu1 %v84_v53 }
  0x3e   :  { %744 = vmatprep.mubr.f32.mxu0 %v58_v54  ;;  %814 = vmatprep.mubr.f32.mxu1 %v60_v55 }
  0x40   :  { %711 = vmatpush1.xpose.msra.mxu0 %v81_v56  ;;  %781 = vmatpush1.xpose.msra.mxu1 %v83_v57 }
  0x41   :  { %848 = vmatprep.subr.mxu0 %v110_v58  ;;  %918 = vmatprep.subr.mxu1 %v112_v59 }
  0x43   :  { %745 = vmatmul.mubr.f32.vlgmr.msra.gmra.mxu0 %v57_v60  ;;  %815 = vmatmul.mubr.f32.vlgmr.msra.gmra.mxu1 %v59_v61 }
  0x44   :  { %849 = vmatpush1.xpose.msra.mxu0 %v109_v62  ;;  %919 = vmatpush1.xpose.msra.mxu1 %v111_v63 }
  0x45   :  { %850 = vmatprep.subr.mxu0 %v86_v0  ;;  %920 = vmatprep.subr.mxu1 %v88_v1 }
  0x46   :  { %884 = vmatprep.mubr.f32.mxu0 %v62_v2  ;;  %954 = vmatprep.mubr.f32.mxu1 %v64_v3 }
  0x48   :  { %851 = vmatpush1.xpose.msra.mxu0 %v85_v4  ;;  %921 = vmatpush1.xpose.msra.mxu1 %v87_v5 }
  0x4b   :  { %885 = vmatmul.mubr.f32.vlgmr.msra.gmra.mxu0 %v61_v6  ;;  %955 = vmatmul.mubr.f32.vlgmr.msra.gmra.mxu1 %v63_v7 }
  0xe3   :  { %v186_v8 = vpop.f32.mrf.mxu0  ;;  %v256_v9 = vpop.f32.mrf.mxu1 }
  0xe4   :  { %v187_v17 = vadd.f32 %v978_v12, %v186_v8 }
  0xe5   :  { %v188_v10 = vpop.f32.mrf.mxu0  ;;  %v258_v11 = vpop.f32.mrf.mxu1 }
  0xe6   :  { %v257_v18 = vadd.f32 %v256_v9, %v187_v17 }
  0xeb   :  { %v326_v13 = vpop.f32.mrf.mxu0  ;;  %v396_v14 = vpop.f32.mrf.mxu1 }
  0xec   :  { %v327_v21 = vadd.f32 %v326_v13, %v257_v18 }
  0xed   :  { %v328_v15 = vpop.f32.mrf.mxu0  ;;  %v398_v16 = vpop.f32.mrf.mxu1 }
  0xee   :  { %v397_v24 = vadd.f32 %v396_v14, %v327_v21 }
  0xf3   :  { %v466_v19 = vpop.f32.mrf.mxu0  ;;  %v536_v20 = vpop.f32.mrf.mxu1 }
  0xf4   :  { %v467_v25 = vadd.f32 %v466_v19, %v397_v24 }
  0xf5   :  { %v468_v22 = vpop.f32.mrf.mxu0  ;;  %v538_v23 = vpop.f32.mrf.mxu1 }
  0xf6   :  { %v537_v30 = vadd.f32 %v536_v20, %v467_v25 }
  0xfb   :  { %v606_v26 = vpop.f32.mrf.mxu0  ;;  %v676_v27 = vpop.f32.mrf.mxu1 }
  0xfc   :  { %v607_v31 = vadd.f32 %v606_v26, %v537_v30 }
  0xfd   :  { %v608_v28 = vpop.f32.mrf.mxu0  ;;  %v678_v29 = vpop.f32.mrf.mxu1 }
  0xfe   :  { %v677_v34 = vadd.f32 %v676_v27, %v607_v31 }
 0x103   :  { %v746_v32 = vpop.f32.mrf.mxu0  ;;  %v816_v33 = vpop.f32.mrf.mxu1 }
 0x104   :  { %v747_v37 = vadd.f32 %v746_v32, %v677_v34 }
 0x105   :  { %v748_v35 = vpop.f32.mrf.mxu0  ;;  %v818_v36 = vpop.f32.mrf.mxu1 }
 0x106   :  { %v817_v38 = vadd.f32 %v816_v33, %v747_v37 }
 0x10b   :  { %v886_v39 = vpop.f32.mrf.mxu0  ;;  %v956_v40 = vpop.f32.mrf.mxu1 }
 0x10c   :  { %v887_v41 = vadd.f32 %v886_v39, %v817_v38 }
 0x10d   :  { %v888_v42 = vpop.f32.mrf.mxu0  ;;  %v958_v43 = vpop.f32.mrf.mxu1 }
 0x10e   :  { %v957_v44 = vadd.f32 %v956_v40, %v887_v41 }
 0x110   :  { %961 = vst.msk [vmem:[#allocation7] sm:$0xff] %vm960_vm0, %v957_v44 }
 0x111   :  { %1035 = shalt.err (!%p1032_p0)
}
 0x112   :  { %971 = dma.vmem_to_hbm [thread:$0]  %s969_s24, 128, %s1090_s3, [#allocation4]  }
 0x113   :  { %1048 = dma.done.wait [#allocation4], 128  }
 0x114   :  { %1049 = vsyncadd [#allocation4], 4294967168 }
 0x115   :  { %975 = vsyncpa [#allocation3], 1 }
 0x116   :  { %976 = vsyncpa [#allocation6], 1 }
 0x117   :  { %977 = vsyncpa [#allocation4], 1 }

</bundles_post_ra>
